<compile_context>
chip_gen: v7x
topology: tpu7x:2x2x1
jax: 0.10.0
libtpu: 0.0.40
codegen_flags: <defaults>
</compile_context>

<pallas_src>
import math

import jax
import jax.numpy as jnp
from jax.experimental import pallas as pl
from jax.experimental.pallas import tpu as pltpu

_LANE = 128
_SUBLANE = 8


def _cdiv(a, b):
    return -(-a // b)


def _round_up(x, n):
    return ((x + n - 1) // n) * n


def _padded_bytes(rows, cols, itemsize):
    """VMEM footprint of a (rows, cols) tile after (8, 128) layout padding."""
    return _round_up(max(rows, 1), _SUBLANE) * _round_up(max(cols, 1), _LANE) * itemsize


# -----------------------------------------------------------------------------
# Kernels
# -----------------------------------------------------------------------------
def _fused_kernel(x1_ref, x2_ref, a_ref, sel_ref, o_ref):
    # x1: (TR, C1), x2: (TR, C2), A_blk: (C1, C2), sel: (C2, G), o: (TR, G)
    # out[r, j] = relu( sum_{c in group j} (x1_r @ A_blk)[c] * x2_r[c] )
    t = jnp.dot(x1_ref[...], a_ref[...], preferred_element_type=jnp.float32)   # MXU
    prod = t * x2_ref[...].astype(jnp.float32)                                 # VPU
    s = jnp.dot(prod, sel_ref[...], preferred_element_type=jnp.float32)        # MXU segmented sum
    o_ref[...] = jnp.maximum(s, 0.0).astype(o_ref.dtype)


def _unfused_kernel(x1_ref, x2_ref, w1_ref, w2_ref, o_ref):
    # Fallback for shapes where A = W1 @ W2^T would not pay (large D, small P).
    p1 = jnp.dot(x1_ref[...], w1_ref[...], preferred_element_type=jnp.float32)
    p2 = jnp.dot(x2_ref[...], w2_ref[...], preferred_element_type=jnp.float32)
    s = jnp.sum(p1 * p2, axis=-1, keepdims=True)
    o_ref[...] = jnp.maximum(s, 0.0).astype(o_ref.dtype)


# -----------------------------------------------------------------------------
# Wrapper
# -----------------------------------------------------------------------------
def projected_dot_product_similarity(tensor_1, tensor_2, w1, w2):
    """tensor_1: (..., D1), tensor_2: (..., D2); returns relu(sum((t1@W1)*(t2@W2), -1))."""
    lead_shape = tensor_1.shape[:-1]
    d1 = tensor_1.shape[-1]
    d2 = tensor_2.shape[-1]
    p = w1.shape[-1]
    out_dtype = jnp.result_type(tensor_1.dtype, tensor_2.dtype, w1.dtype, w2.dtype)

    m = math.prod(lead_shape) if lead_shape else 1
    if m == 0:
        return jnp.zeros(lead_shape, out_dtype)

    x1 = tensor_1.reshape(m, d1)
    x2 = tensor_2.reshape(m, d2)

    its1 = jnp.dtype(x1.dtype).itemsize
    its2 = jnp.dtype(x2.dtype).itemsize
    out_its = jnp.dtype(out_dtype).itemsize
    act_dtype = jnp.promote_types(tensor_1.dtype, tensor_2.dtype)
    act_its = jnp.dtype(act_dtype).itemsize

    # ---- VMEM plan budget (per-generation aware) ---------------------------
    try:
        vmem_cap = int(pltpu.get_tpu_info().vmem_capacity_bytes)
    except Exception:
        vmem_cap = 64 << 20                      # v7x per-TC size == safe lower bound
    vmem_cap = min(max(vmem_cap, 32 << 20), 128 << 20)
    plan_budget = min(40 << 20, (vmem_cap * 3) // 5)          # <= 40 MiB plan everywhere
    vmem_limit = int(min(vmem_cap, plan_budget + (12 << 20)))  # explicit scoped-VMEM limit

    # ---- Fusion gate: only fuse W1 @ W2^T when it reduces FLOPs and fits ---
    a_vmem = _padded_bytes(d1, d2, act_its)
    fuse = (d1 * d2 <= p * (d1 + d2)) and (a_vmem <= (8 << 20))

    if fuse:
        # A = W1 @ W2^T in f32 once, then cast to the activation dtype so the
        # in-kernel matmul runs at native MXU rate (accumulation stays f32).
        a = jnp.dot(w1, w2.T, preferred_element_type=jnp.float32,
                    precision=jax.lax.Precision.HIGHEST).astype(act_dtype)

        # Row packing for narrow D: pack g rows per 128-lane kernel row.
        g = 1
        if d1 <= 64 and d2 <= 64 and _LANE % d1 == 0 and _LANE % d2 == 0:
            g_cand = _LANE // max(d1, d2)
            if g_cand >= 2 and m % g_cand == 0:
                g = g_cand
        c1, c2 = g * d1, g * d2
        if g > 1:
            x1k = x1.reshape(m // g, c1)         # free view of contiguous HBM rows
            x2k = x2.reshape(m // g, c2)
            a_op = jnp.kron(jnp.eye(g, dtype=a.dtype), a)          # block-diag (c1, c2)
        else:
            x1k, x2k, a_op = x1, x2, a
        # Segmented-sum selector: ones over each d2-lane group -> column j.
        sel = jnp.kron(jnp.eye(g, dtype=jnp.float32), jnp.ones((d2, 1), jnp.float32))
        m_k = m // g

        c1p, c2p = _round_up(c1, _LANE), _round_up(c2, _LANE)
        per_row_vmem = (2 * c1p * its1 + 2 * c2p * its2            # x1/x2 double buffers
                        + 2 * _LANE * out_its                      # out double buffer (lane-padded)
                        + 3 * c2p * 4)                             # f32 temporaries
        fixed_vmem = 2 * _padded_bytes(c1, c2, act_its) + 2 * _padded_bytes(c2, g, 4)
        per_row_hbm = c1 * its1 + c2 * its2 + g * out_its
        fixed_hbm = c1 * c2 * act_its + c2 * g * 4
        flops = 2 * m_k * (c1 * c2 + c2 * g)
        kernel = _fused_kernel
        operands = [x1k, x2k, a_op, sel]
    else:
        g = 1
        x1k, x2k = x1, x2
        m_k = m
        c1p, c2p, pp = _round_up(d1, _LANE), _round_up(d2, _LANE), _round_up(p, _LANE)
        w_its1 = jnp.dtype(w1.dtype).itemsize
        w_its2 = jnp.dtype(w2.dtype).itemsize
        per_row_vmem = (2 * c1p * its1 + 2 * c2p * its2
                        + 2 * _LANE * out_its
                        + 3 * pp * 4)                              # p1, p2, prod f32 temps
        fixed_vmem = (2 * _padded_bytes(d1, p, w_its1)
                      + 2 * _padded_bytes(d2, p, w_its2))
        per_row_hbm = d1 * its1 + d2 * its2 + out_its
        fixed_hbm = d1 * p * w_its1 + d2 * p * w_its2
        flops = 2 * m_k * p * (d1 + d2 + 1)
        kernel = _unfused_kernel
        operands = [x1k, x2k, w1, w2]

    # ---- Row-tile size ------------------------------------------------------
    # As many kernel rows as the padded-footprint plan allows, but keep per-step
    # HBM traffic >= ~2 MiB (amortize per-step overhead) and >= ~8 grid steps on
    # large inputs (pipelining + v7x 2-core sharding).
    TARGET_STEP_BYTES = 2 << 20
    TARGET_TILES = 8
    avail = max(plan_budget - fixed_vmem, per_row_vmem * _SUBLANE)
    vmem_rows = max(_SUBLANE, (avail // per_row_vmem) // _LANE * _LANE)
    traffic_rows = _round_up(max(1, TARGET_STEP_BYTES // per_row_hbm), _LANE)
    split_rows = _round_up(_cdiv(m_k, TARGET_TILES), _LANE)
    tile_rows = min(vmem_rows, max(traffic_rows, split_rows))
    if tile_rows >= m_k:
        tile_rows = _round_up(m_k, _SUBLANE)     # single tile covering everything

    num_tiles = _cdiv(m_k, tile_rows)
    if num_tiles == 1 and tile_rows > m_k:
        # Tiny-input pad only (a few rows).  Large inputs use the ragged boundary
        # block instead: its junk rows are safe because all math is per-row, and
        # they are sliced off below.
        pad = tile_rows - m_k
        operands[0] = jnp.pad(operands[0], ((0, pad), (0, 0)))
        operands[1] = jnp.pad(operands[1], ((0, pad), (0, 0)))

    out_rows = num_tiles * tile_rows
    in_specs = [
        pl.BlockSpec((tile_rows, operands[0].shape[1]), lambda i: (i, 0)),  # x1 row tile
        pl.BlockSpec((tile_rows, operands[1].shape[1]), lambda i: (i, 0)),  # x2 row tile
        pl.BlockSpec(operands[2].shape, lambda i: (0, 0)),                  # resident weight
        pl.BlockSpec(operands[3].shape, lambda i: (0, 0)),                  # resident weight / selector
    ]
    out_spec = pl.BlockSpec((tile_rows, g), lambda i: (i, 0))

    cost = pl.CostEstimate(
        flops=int(flops),
        transcendentals=0,
        bytes_accessed=int(m_k * per_row_hbm + fixed_hbm),
    )

    out = pl.pallas_call(
        kernel,
        out_shape=jax.ShapeDtypeStruct((out_rows, g), out_dtype),
        grid_spec=pltpu.PrefetchScalarGridSpec(
            num_scalar_prefetch=0,
            grid=(num_tiles,),
            in_specs=in_specs,
            out_specs=out_spec,
        ),
        compiler_params=pltpu.CompilerParams(
            dimension_semantics=("parallel",),
            vmem_limit_bytes=vmem_limit,
        ),
        cost_estimate=cost,
    )(*operands)

    # (m_k, g) rows are in original row order; reshape back is a free view.
    return out[:m_k].reshape(-1)[:m].reshape(lead_shape)


# -----------------------------------------------------------------------------
# Demo / self-check
# -----------------------------------------------------------------------------
def xavier_uniform(key, fan_in, fan_out, dtype=jnp.float32):
    bound = (6.0 / (fan_in + fan_out)) ** 0.5
    return jax.random.uniform(key, (fan_in, fan_out), dtype=dtype,
                              minval=-bound, maxval=bound)


def _reference(t1, t2, w1, w2):
    p1 = jnp.matmul(t1, w1, precision=jax.lax.Precision.HIGHEST)
    p2 = jnp.matmul(t2, w2, precision=jax.lax.Precision.HIGHEST)
    return jnp.maximum(jnp.sum(p1 * p2, axis=-1), 0.0)


def _check(name, out, ref, atol=1e-3, rtol=1e-3):
    assert out.shape == ref.shape, (name, out.shape, ref.shape)
    err = float(jnp.max(jnp.abs(out - ref))) if out.size else 0.0
    assert jnp.allclose(out, ref, atol=atol, rtol=rtol), (name, err)


if __name__ == "__main__":
    # Module hyperparameters (synthetic, deterministic init).
    tensor_1_dim = 32
    tensor_2_dim = 32
    projected_dim = 64
    batch, seq = 2, 8

    key = jax.random.PRNGKey(0)
    k1, k2, k3, k4 = jax.random.split(key, 4)
    w1 = xavier_uniform(k1, tensor_1_dim, projected_dim)
    w2 = xavier_uniform(k2, tensor_2_dim, projected_dim)
    tensor_1 = jax.random.normal(k3, (batch, seq, tensor_1_dim), jnp.float32)
    tensor_2 = jax.random.normal(k4, (batch, seq, tensor_2_dim), jnp.float32)

    # 1) Fused + row-packed path (narrow D, m divisible by the pack factor).
    out = jax.block_until_ready(
        projected_dot_product_similarity(tensor_1, tensor_2, w1, w2))
    _check("packed_fused", out, _reference(tensor_1, tensor_2, w1, w2))

    # 2) Fused, unpacked path (m not divisible by the pack factor).
    t1b, t2b = tensor_1[:, :5, :], tensor_2[:, :5, :]
    out_b = jax.block_until_ready(
        projected_dot_product_similarity(t1b, t2b, w1, w2))
    _check("unpacked_fused", out_b, _reference(t1b, t2b, w1, w2))

    # 3) Unfused fallback path (large D relative to P).
    d_big, p_small = 256, 16
    kw1, kw2, kx1, kx2 = jax.random.split(jax.random.PRNGKey(1), 4)
    w1c = xavier_uniform(kw1, d_big, p_small)
    w2c = xavier_uniform(kw2, d_big, p_small)
    t1c = jax.random.normal(kx1, (batch, seq, d_big), jnp.float32)
    t2c = jax.random.normal(kx2, (batch, seq, d_big), jnp.float32)
    out_c = jax.block_until_ready(
        projected_dot_product_similarity(t1c, t2c, w1c, w2c))
    _check("unfused", out_c, _reference(t1c, t2c, w1c, w2c))

    print("KERNEL_OK")
</pallas_src>

<mosaic_0001>
module attributes {stable_mosaic.version = 11 : i64} {
  func.func @_fused_kernel(%arg0: i32, %arg1: memref<8x128xf32, #tpu.memory_space<vmem>>, %arg2: memref<8x128xf32, #tpu.memory_space<vmem>>, %arg3: memref<128x128xf32, #tpu.memory_space<vmem>>, %arg4: memref<128x4xf32, #tpu.memory_space<vmem>>, %arg5: memref<8x4xf32, #tpu.memory_space<vmem>>) attributes {dimension_semantics = [#tpu.dimension_semantics<parallel>], iteration_bounds = array<i64: 1>, scalar_prefetch = 0 : i64, scratch_operands = 0 : i64, tpu.core_type = #tpu.core_type<tc>, window_params = [{transform_indices = @transform_0, window_bounds = array<i64: 8, 128>}, {transform_indices = @transform_1, window_bounds = array<i64: 8, 128>}, {pipeline_mode = #tpu.pipeline_mode<synchronous>, transform_indices = @transform_2, window_bounds = array<i64: 128, 128>}, {pipeline_mode = #tpu.pipeline_mode<synchronous>, transform_indices = @transform_3, window_bounds = array<i64: 128, 4>}, {transform_indices = @transform_4, window_bounds = array<i64: 8, 4>}]} {
    %c0 = arith.constant 0 : index
    %c0_0 = arith.constant 0 : index
    %0 = vector.load %arg1[%c0, %c0_0] : memref<8x128xf32, #tpu.memory_space<vmem>>, vector<8x128xf32>
    %c0_1 = arith.constant 0 : index
    %c0_2 = arith.constant 0 : index
    %1 = vector.load %arg3[%c0_1, %c0_2] : memref<128x128xf32, #tpu.memory_space<vmem>>, vector<128x128xf32>
    %cst = arith.constant dense<0.000000e+00> : vector<8x128xf32>
    %2 = tpu.matmul %0, %1, %cst {dimension_numbers = #tpu.dot_dimension_numbers<[1], [0], [0], [1], [0, 0, 1, 1], [], []>} : vector<8x128xf32>, vector<128x128xf32>, vector<8x128xf32> -> vector<8x128xf32>
    %c0_3 = arith.constant 0 : index
    %c0_4 = arith.constant 0 : index
    %3 = vector.load %arg2[%c0_3, %c0_4] : memref<8x128xf32, #tpu.memory_space<vmem>>, vector<8x128xf32>
    %4 = arith.mulf %2, %3 : vector<8x128xf32>
    %c0_5 = arith.constant 0 : index
    %c0_6 = arith.constant 0 : index
    %5 = vector.load %arg4[%c0_5, %c0_6] : memref<128x4xf32, #tpu.memory_space<vmem>>, vector<128x4xf32>
    %cst_7 = arith.constant dense<0.000000e+00> : vector<8x4xf32>
    %6 = tpu.matmul %4, %5, %cst_7 {dimension_numbers = #tpu.dot_dimension_numbers<[1], [0], [0], [1], [0, 0, 1, 1], [], []>} : vector<8x128xf32>, vector<128x4xf32>, vector<8x4xf32> -> vector<8x4xf32>
    %cst_8 = arith.constant 0.000000e+00 : f32
    %7 = vector.broadcast %cst_8 : f32 to vector<8x4xf32>
    %8 = arith.maximumf %6, %7 : vector<8x4xf32>
    %c0_9 = arith.constant 0 : index
    %c0_10 = arith.constant 0 : index
    %9 = vector.load %arg5[%c0_9, %c0_10] : memref<8x4xf32, #tpu.memory_space<vmem>>, vector<8x4xf32>
    tpu.vector_store %arg5[%c0_9, %c0_10], %8 {strides = array<i32>} : memref<8x4xf32, #tpu.memory_space<vmem>>, vector<8x4xf32>,
    return
  }
  func.func @transform_0(%arg0: i32) -> (i32, i32) {
    %c0_i32 = arith.constant 0 : i32
    %c0_i32_0 = arith.constant 0 : i32
    return %arg0, %c0_i32 : i32, i32
  }
  func.func @transform_1(%arg0: i32) -> (i32, i32) {
    %c0_i32 = arith.constant 0 : i32
    %c0_i32_0 = arith.constant 0 : i32
    return %arg0, %c0_i32 : i32, i32
  }
  func.func @transform_2(%arg0: i32) -> (i32, i32) {
    %c0_i32 = arith.constant 0 : i32
    %c0_i32_0 = arith.constant 0 : i32
    %c0_i32_1 = arith.constant 0 : i32
    return %c0_i32, %c0_i32_0 : i32, i32
  }
  func.func @transform_3(%arg0: i32) -> (i32, i32) {
    %c0_i32 = arith.constant 0 : i32
    %c0_i32_0 = arith.constant 0 : i32
    %c0_i32_1 = arith.constant 0 : i32
    return %c0_i32, %c0_i32_0 : i32, i32
  }
  func.func @transform_4(%arg0: i32) -> (i32, i32) {
    %c0_i32 = arith.constant 0 : i32
    %c0_i32_0 = arith.constant 0 : i32
    return %arg0, %c0_i32 : i32, i32
  }
}

</mosaic_0001>

<bundles_post_ra>
// kernel: tpu_custom_call.1
= control target key start
LH: loop header
LB: loop body
LE: loop exit
PB: predicated region body
PF: predicated region fallthrough
CT: control target
= control target key end

     0   :  { %9 = vsyncpa [#allocation3], 0  ;;  %s392_s15 = smov [#allocation2]   ;;  %s551_s0 = inlined_call_operand.vmem [shape: f32[8,128], index: 0, kind: input, shape index: {}]   ;;  %s552_s1 = inlined_call_operand.hbm [shape: f32[8,128], index: 1, kind: input, shape index: {}]   ;;  %s553_s2 = inlined_call_operand.vmem [shape: f32[128,128], index: 2, kind: input, shape index: {}]   ;;  %s554_s3 = inlined_call_operand.vmem [shape: f32[128,4], index: 3, kind: input, shape index: {}]   ;;  %s555_s4 = inlined_call_operand.vmem [shape: f32[8,4], index: 4, kind: output, shape index: {}]  }
   0x1   :  { %s18_s16 = sshll.u32 %s392_s15, 4  ;;  %s368_s19 = scalar_lea.hbm %s552_s1, 128  ;;  %s19_s16 = int_to_ptr.vmem [resolvable:$true] %s18_s16 }
   0x2   :  { %p369_p0 = scmp.ne.s32.totalorder %s552_s1, %s368_s19  ;;  %p372_p1 = scmp.lt.u32.totalorder %s368_s19, %s552_s1 }
   0x4   :  { %p374_p2 = pnand %p372_p1, %p369_p0 }
   0x6   :  { %377 = shalt.err (!%p374_p2)
}
   0x7   :  { %s378_s24 = scalar_lea.vmem %s19_s16, 128  ;;  %p383_p4 = scmp.lt.s32.totalorder %s19_s16, %s19_s16 }
   0x8   :  { %p379_p3 = scmp.ne.s32.totalorder %s19_s16, %s378_s24  ;;  %p384_p5 = scmp.lt.s32.totalorder %s378_s24, %s378_s24 }
   0xa   :  { %p385_p6 = por %p384_p5, %p383_p4 }
   0xc   :  { %p386_p7 = pnand %p385_p6, %p379_p3 }
   0xe   :  { %389 = shalt.err (!%p386_p7)
}
   0xf   :  { %21 = dma.hbm_to_vmem [thread:$0]  %s552_s1, 128, %s19_s16, [#allocation3]  }
  0x10   :  { %390 = dma.done.wait [#allocation3], 128  }
  0x11   :  { %391 = vsyncadd [#allocation3], 4294967168  ;;  %v393_v0 = vmov 0.0|0.0   ;;  %vm394_vm0 = vmmov 0   ;;  %v395_v1 = vmov 0.0   ;;  %v30_v2 = vld [vmem:[%s553_s2] sm:$0xff] }
  0x12   :  { %316 = vmatprep.subr.bf16.mxu0 %v393_v0  ;;  %278 = vmatprep.mubr.msk.f32.mxu0 %vm394_vm0, %v395_v1  ;;  %v31_v3 = vld [vmem:[%s553_s2 + $0x8] sm:$0xff]  ;;  %v32_v4 = vld [vmem:[%s553_s2 + $0x10] sm:$0xff]  ;;  %v33_v6 = vld [vmem:[%s553_s2 + $0x18] sm:$0xff]  ;;  %vm205_vm1 = vcmask 31744  }
  0x13   :  { %340 = vmatprep.subr.bf16.mxu1 %v393_v0  ;;  %313 = vmatprep.mubr.msk.f32.mxu1 %vm394_vm0, %v395_v1  ;;  %v317_v5 = vpack.c.bf16 %v31_v3, %v30_v2  ;;  %v320_v7 = vpack.c.bf16 %v33_v6, %v32_v4  ;;  %v34_v8 = vld [vmem:[%s553_s2 + $0x20] sm:$0xff]  ;;  %v35_v9 = vld [vmem:[%s553_s2 + $0x28] sm:$0xff]  ;;  %v120_v12 = vld [vmem:[%s554_s3 + $0x10] sm:$0xff] }
  0x14   :  { %v118_v10 = vld [vmem:[%s554_s3] sm:$0xff]  ;;  %v119_v11 = vld [vmem:[%s554_s3 + $0x8] sm:$0xff]  ;;  %v121_v13 = vld [vmem:[%s554_s3 + $0x18] sm:$0xff]  ;;  %v323_v14 = vpack.c.bf16 %v35_v9, %v34_v8 }
  0x15   :  { %318 = vmatpush3.bf16.msra.mxu0 %v317_v5  ;;  %v341_v15 = vpack.c.bf16 %v119_v11, %v118_v10  ;;  %v36_v16 = vld [vmem:[%s553_s2 + $0x30] sm:$0xff]  ;;  %v37_v17 = vld [vmem:[%s553_s2 + $0x38] sm:$0xff]  ;;  %v344_v18 = vpack.c.bf16 %v121_v13, %v120_v12  ;;  %v122_v19 = vld [vmem:[%s554_s3 + $0x20] sm:$0xff] }
  0x16   :  { %319 = vmatprep.subr.bf16.mxu0 %v393_v0  ;;  %v123_v20 = vld [vmem:[%s554_s3 + $0x28] sm:$0xff]  ;;  %v326_v21 = vpack.c.bf16 %v37_v17, %v36_v16  ;;  %v38_v22 = vld [vmem:[%s553_s2 + $0x40] sm:$0xff]  ;;  %v124_v25 = vld [vmem:[%s554_s3 + $0x30] sm:$0xff] }
  0x17   :  { %342 = vmatpush3.bf16.msra.mxu1 %v341_v15  ;;  %v39_v23 = vld [vmem:[%s553_s2 + $0x48] sm:$0xff]  ;;  %v347_v24 = vpack.c.bf16 %v123_v20, %v122_v19  ;;  %v125_v26 = vld [vmem:[%s554_s3 + $0x38] sm:$0xff]  ;;  %v40_v28 = vld [vmem:[%s553_s2 + $0x50] sm:$0xff] }
  0x18   :  { %343 = vmatprep.subr.bf16.mxu1 %v393_v0  ;;  %v329_v27 = vpack.c.bf16 %v39_v23, %v38_v22  ;;  %v41_v29 = vld [vmem:[%s553_s2 + $0x58] sm:$0xff]  ;;  %v350_v30 = vpack.c.bf16 %v125_v26, %v124_v25  ;;  %v126_v31 = vld [vmem:[%s554_s3 + $0x40] sm:$0xff]  ;;  %v127_v32 = vld [vmem:[%s554_s3 + $0x48] sm:$0xff] }
  0x19   :  { %321 = vmatpush3.bf16.msra.mxu0 %v320_v7  ;;  %v332_v33 = vpack.c.bf16 %v41_v29, %v40_v28  ;;  %v42_v34 = vld [vmem:[%s553_s2 + $0x60] sm:$0xff]  ;;  %v43_v35 = vld [vmem:[%s553_s2 + $0x68] sm:$0xff]  ;;  %v353_v36 = vpack.c.bf16 %v127_v32, %v126_v31  ;;  %v128_v37 = vld [vmem:[%s554_s3 + $0x50] sm:$0xff] }
  0x1a   :  { %322 = vmatprep.subr.bf16.mxu0 %v393_v0  ;;  %v129_v38 = vld [vmem:[%s554_s3 + $0x58] sm:$0xff]  ;;  %v335_v39 = vpack.c.bf16 %v43_v35, %v42_v34  ;;  %v44_v40 = vld [vmem:[%s553_s2 + $0x70] sm:$0xff]  ;;  %v130_v43 = vld [vmem:[%s554_s3 + $0x60] sm:$0xff] }
  0x1b   :  { %345 = vmatpush3.bf16.msra.mxu1 %v344_v18  ;;  %v45_v41 = vld [vmem:[%s553_s2 + $0x78] sm:$0xff]  ;;  %v356_v42 = vpack.c.bf16 %v129_v38, %v128_v37  ;;  %v131_v44 = vld [vmem:[%s554_s3 + $0x68] sm:$0xff]  ;;  %v29_v47 = vld [vmem:[%s551_s0] sm:$0xff] }
  0x1c   :  { %346 = vmatprep.subr.bf16.mxu1 %v393_v0  ;;  %v338_v45 = vpack.c.bf16 %v45_v41, %v44_v40  ;;  %v359_v46 = vpack.c.bf16 %v131_v44, %v130_v43  ;;  %v132_v48 = vld [vmem:[%s554_s3 + $0x70] sm:$0xff]  ;;  %v133_v49 = vld [vmem:[%s554_s3 + $0x78] sm:$0xff]  ;;  %v116_v51 = vld [vmem:[#allocation2] sm:$0xff] }
  0x1d   :  { %324 = vmatpush3.bf16.msra.mxu0 %v323_v14  ;;  %v362_v50 = vpack.c.bf16 %v133_v49, %v132_v48 }
  0x1e   :  { %325 = vmatprep.subr.bf16.mxu0 %v393_v0 }
  0x1f   :  { %348 = vmatpush3.bf16.msra.mxu1 %v347_v24 }
  0x20   :  { %349 = vmatprep.subr.bf16.mxu1 %v393_v0 }
  0x21   :  { %327 = vmatpush3.bf16.msra.mxu0 %v326_v21 }
  0x22   :  { %328 = vmatprep.subr.bf16.mxu0 %v393_v0 }
  0x23   :  { %351 = vmatpush3.bf16.msra.mxu1 %v350_v30 }
  0x24   :  { %352 = vmatprep.subr.bf16.mxu1 %v393_v0 }
  0x25   :  { %330 = vmatpush3.bf16.msra.mxu0 %v329_v27 }
  0x26   :  { %331 = vmatprep.subr.bf16.mxu0 %v393_v0 }
  0x27   :  { %354 = vmatpush3.bf16.msra.mxu1 %v353_v36 }
  0x28   :  { %355 = vmatprep.subr.bf16.mxu1 %v393_v0 }
  0x29   :  { %333 = vmatpush3.bf16.msra.mxu0 %v332_v33 }
  0x2a   :  { %334 = vmatprep.subr.bf16.mxu0 %v393_v0 }
  0x2b   :  { %357 = vmatpush3.bf16.msra.mxu1 %v356_v42 }
  0x2c   :  { %358 = vmatprep.subr.bf16.mxu1 %v393_v0 }
  0x2d   :  { %336 = vmatpush3.bf16.msra.mxu0 %v335_v39 }
  0x2e   :  { %337 = vmatprep.subr.bf16.mxu0 %v393_v0 }
  0x2f   :  { %360 = vmatpush3.bf16.msra.mxu1 %v359_v46 }
  0x30   :  { %361 = vmatprep.subr.bf16.mxu1 %v393_v0 }
  0x31   :  { %339 = vmatpush3.bf16.msra.mxu0 %v338_v45 }
  0x33   :  { %363 = vmatpush3.bf16.msra.mxu1 %v362_v50 }
  0x34   :  { %279 = vmatmul.mubr.f32.vlgmr.msra.gmra.mrb[0].mxu0 %v29_v47 }
 0x107   :  { %v112_v52 = vpop.f32.mrb[0].mxu0 }
 0x108   :  { %v117_v53 = vmul.f32 %v116_v51, %v112_v52  ;;  %v280_v54 = vpop.f32.mrb[1].mxu0 }
 0x10a   :  { %314 = vmatmul.mubr.f32.vlgmr.msra.gmra.mrb[0].mxu1 %v117_v53 }
 0x1dd   :  { %v200_v55 = vpop.f32.mrb[0].mxu1 }
 0x1de   :  { %v204_v56 = vmax.f32 %v200_v55, 0.0  ;;  %v315_v57 = vpop.f32.mrb[1].mxu1 }
 0x1e0   :  { %206 = vst.msk [vmem:[%s555_s4] sm:$0xff] %vm205_vm1, %v204_v56 }
 0x1e1   :  { %211 = vsyncpa [#allocation3], 1 }

</bundles_post_ra>
